<compile_context>
chip_gen: v5e
topology: v5e:2x2
jax: 0.10.0
libtpu: 0.0.40
codegen_flags: <defaults>
</compile_context>

<pallas_src>
import functools

import jax
import jax.numpy as jnp
from jax.experimental import pallas as pl
from jax.experimental.pallas import tpu as pltpu

_SQRT_2_OVER_PI = 0.7978845608028654


def _round_up(n, m):
    return ((n + m - 1) // m) * m


def _cdiv(a, b):
    return (a + b - 1) // b


# ---------------------------------------------------------------------------
# Kernel
# ---------------------------------------------------------------------------
def _mlp_kernel(x_ref, w1_ref, w2_ref, b1_ref, b2_ref, out_ref, acc_ref):
    # x_ref:   (tm, D_pad)   input dtype (cast to bf16 in-kernel)
    # w1_ref:  (D_pad, th)   bf16   (column chunk of W1^T)
    # w2_ref:  (th, D_pad)   bf16   (row chunk of W2^T)
    # b1_ref:  (1, th)       f32
    # b2_ref:  (1, D_pad)    f32
    # out_ref: (tm, D_pad)   input dtype
    # acc_ref: (tm, D_pad)   f32 scratch (partial second matmul)
    j = pl.program_id(1)

    @pl.when(j == 0)
    def _():
        acc_ref[...] = jnp.zeros_like(acc_ref)

    x = x_ref[...].astype(jnp.bfloat16)

    # First linear (this chunk of hidden units): f32 accumulation on the MXU.
    h = jnp.dot(x, w1_ref[...], preferred_element_type=jnp.float32)
    h = h + b1_ref[...]

    # GELU in f32 (tanh approximation; EUP tanh, element-wise math stays f32).
    h = 0.5 * h * (1.0 + jnp.tanh(_SQRT_2_OVER_PI * (h + 0.044715 * h * h * h)))

    # Second linear: partial contraction over this hidden chunk, accumulated in f32.
    acc_ref[...] += jnp.dot(h.astype(w2_ref.dtype), w2_ref[...],
                            preferred_element_type=jnp.float32)

    @pl.when(j == pl.num_programs(1) - 1)
    def _():
        out_ref[...] = (acc_ref[...] + b2_ref[...]).astype(out_ref.dtype)


# ---------------------------------------------------------------------------
# One-time parameter preparation (hoisted out of the forward path)
# ---------------------------------------------------------------------------
def prepare_mlp_params(w1, b1, w2, b2):
    """Transpose, zero-pad to lane-dense (128-multiple) shapes, cast to bf16.

    w1: [4*D, D] (PyTorch Linear layout), b1: [4*D], w2: [D, 4*D], b2: [D].
    Padded lanes/rows are exact zeros, so they contribute nothing.
    """
    H, D = w1.shape
    D_pad = _round_up(D, 128)
    H_pad = _round_up(H, 128)
    w1p = jnp.pad(w1.T.astype(jnp.float32),
                  ((0, D_pad - D), (0, H_pad - H))).astype(jnp.bfloat16)   # [D_pad, H_pad]
    w2p = jnp.pad(w2.T.astype(jnp.float32),
                  ((0, H_pad - H), (0, D_pad - D))).astype(jnp.bfloat16)   # [H_pad, D_pad]
    b1p = jnp.pad(b1.astype(jnp.float32), (0, H_pad - H)).reshape(1, H_pad)
    b2p = jnp.pad(b2.astype(jnp.float32), (0, D_pad - D)).reshape(1, D_pad)
    return w1p, w2p, b1p, b2p


# ---------------------------------------------------------------------------
# Tile selection (generation-aware VMEM budgeting)
# ---------------------------------------------------------------------------
def _vmem_capacity_bytes():
    try:
        return int(pltpu.get_tpu_info().vmem_capacity_bytes)
    except Exception:
        return 64 * 1024 * 1024        # conservative (v7x per-TC VMEM)


def _choose_tiles(M, D_pad, H_pad, x_bytes, o_bytes, budget):
    """Pick (tm, th): large row tile, >=2 row steps, stream H chunks if needed."""
    TM_MAX = 512
    n_row_steps = max(2, _cdiv(M, TM_MAX))       # >=2 steps so both v7x TCs get work
    gran = 128 if M >= 256 else 8
    tm = max(8, min(TM_MAX, _round_up(_cdiv(M, n_row_steps), gran)))

    headroom = 2 * 1024 * 1024                   # Mosaic internal scratch

    def needed(tm_, th_):
        n_h_ = _cdiv(H_pad, th_)
        wbuf = 1 if n_h_ == 1 else 2             # Buffered(1) when resident, else dbl-buf
        w = wbuf * 2 * (D_pad * th_ + th_ * D_pad)        # bf16 W1/W2 blocks
        b = wbuf * 4 * th_ + 4 * D_pad                    # f32 biases
        io = 2 * tm_ * D_pad * x_bytes + 2 * tm_ * D_pad * o_bytes   # dbl-buffered I/O
        acc = 4 * tm_ * D_pad                             # f32 accumulator scratch
        live = (4 * tm_ * th_          # h (f32)
                + 2 * tm_ * th_        # h cast to bf16
                + 2 * tm_ * D_pad      # x cast to bf16
                + 4 * tm_ * D_pad)     # partial y (f32) before +=
        return w + b + io + acc + live + headroom

    # Prefer keeping the row tile large: stream the hidden dim in chunks first.
    th = H_pad
    while needed(tm, th) > budget and th >= 1024 and (th // 2) % 128 == 0:
        th //= 2                                  # th always divides H_pad exactly
    # If it still does not fit, shrink the row tile.
    while needed(tm, th) > budget and tm > 64:
        tm = max(64, _round_up(tm // 2, 8))
    return tm, th


def _maybe_single_buffered(shape, index_map, enable):
    """BlockSpec with single-buffering for constant-index operands (with fallback)."""
    if enable:
        try:
            return pl.BlockSpec(shape, index_map, pipeline_mode=pl.Buffered(1))
        except Exception:
            pass
    return pl.BlockSpec(shape, index_map)


# ---------------------------------------------------------------------------
# Forward
# ---------------------------------------------------------------------------
@functools.partial(jax.jit, static_argnames=("single_buffer",))
def _mlp_forward_impl(x, w1p, w2p, b1p, b2p, single_buffer=True):
    orig_dtype = x.dtype
    B, S, D = x.shape
    D_pad, H_pad = w1p.shape
    M = B * S

    x2 = x.reshape(M, D)
    if D != D_pad:                                   # lane-dense contraction dim
        x2 = jnp.pad(x2, ((0, 0), (0, D_pad - D)))

    x_bytes = jnp.dtype(x2.dtype).itemsize
    o_bytes = jnp.dtype(orig_dtype).itemsize

    vmem_cap = _vmem_capacity_bytes()
    tm, th = _choose_tiles(M, D_pad, H_pad, x_bytes, o_bytes,
                           budget=int(vmem_cap * 0.65))
    n_rows = _cdiv(M, tm)
    n_h = _cdiv(H_pad, th)
    resident = (n_h == 1)
    sb = bool(single_buffer)

    if resident:
        w1_spec = _maybe_single_buffered((D_pad, th), lambda i, j: (0, 0), sb)
        w2_spec = _maybe_single_buffered((th, D_pad), lambda i, j: (0, 0), sb)
        b1_spec = _maybe_single_buffered((1, th), lambda i, j: (0, 0), sb)
    else:
        w1_spec = pl.BlockSpec((D_pad, th), lambda i, j: (0, j))
        w2_spec = pl.BlockSpec((th, D_pad), lambda i, j: (j, 0))
        b1_spec = pl.BlockSpec((1, th), lambda i, j: (0, j))
    b2_spec = _maybe_single_buffered((1, D_pad), lambda i, j: (0, 0), sb)

    cost = pl.CostEstimate(
        flops=int(4 * M * D_pad * H_pad),                 # two matmuls
        transcendentals=int(M * H_pad),                   # tanh in GELU
        bytes_accessed=int(x2.size * x_bytes + w1p.size * 2 + w2p.size * 2
                           + b1p.size * 4 + b2p.size * 4 + M * D_pad * o_bytes),
    )

    out = pl.pallas_call(
        _mlp_kernel,
        out_shape=jax.ShapeDtypeStruct((M, D_pad), orig_dtype),
        grid_spec=pltpu.PrefetchScalarGridSpec(
            num_scalar_prefetch=0,
            grid=(n_rows, n_h),
            in_specs=[
                pl.BlockSpec((tm, D_pad), lambda i, j: (i, 0)),   # x row tile
                w1_spec, w2_spec, b1_spec, b2_spec,
            ],
            out_specs=pl.BlockSpec((tm, D_pad), lambda i, j: (i, 0)),
            scratch_shapes=[pltpu.VMEM((tm, D_pad), jnp.float32)],
        ),
        compiler_params=pltpu.CompilerParams(
            dimension_semantics=("parallel", "arbitrary"),
            vmem_limit_bytes=int(min(vmem_cap * 0.85,
                                     vmem_cap - 2 * 1024 * 1024)),
        ),
        cost_estimate=cost,
    )(x2, w1p, w2p, b1p, b2p)

    return out[:, :D].reshape(B, S, D)


def mlp_forward(x, w1p, w2p, b1p, b2p):
    """Pallas MLP forward (inference). x: [B, S, D]; params from prepare_mlp_params."""
    try:
        return _mlp_forward_impl(x, w1p, w2p, b1p, b2p, single_buffer=True)
    except Exception:
        # Fallback if this JAX/Mosaic build rejects Buffered(1) single-buffering.
        return _mlp_forward_impl(x, w1p, w2p, b1p, b2p, single_buffer=False)


def _reference(x, w1, b1, w2, b2):
    """Pure-JAX f32 reference matching nn.Linear/GELU/Linear (dropout = identity)."""
    h = jnp.einsum("bsd,hd->bsh", x, w1) + b1
    h = 0.5 * h * (1.0 + jax.lax.erf(h / jnp.sqrt(2.0).astype(h.dtype)))   # exact GELU
    return jnp.einsum("bsh,dh->bsd", h, w2) + b2


if __name__ == "__main__":
    # Small shapes consistent with the module: batch=2, seq=8, dim=32 -> hidden=128.
    B, S, dim = 2, 8, 32
    hidden = 4 * dim

    key = jax.random.PRNGKey(0)
    kx, k1, kb1, k2, kb2 = jax.random.split(key, 5)
    x = jax.random.normal(kx, (B, S, dim), dtype=jnp.float32)
    w1 = jax.random.normal(k1, (hidden, dim), dtype=jnp.float32) * 0.1
    b1 = jax.random.normal(kb1, (hidden,), dtype=jnp.float32) * 0.1
    w2 = jax.random.normal(k2, (dim, hidden), dtype=jnp.float32) * 0.1
    b2 = jax.random.normal(kb2, (dim,), dtype=jnp.float32) * 0.1

    # One-time weight preparation (hoisted out of the per-call path).
    params = prepare_mlp_params(w1, b1, w2, b2)
    params = tuple(jax.block_until_ready(p) for p in params)

    out = mlp_forward(x, *params)
    out = jax.block_until_ready(out)

    ref = _reference(x, w1, b1, w2, b2)
    assert out.shape == (B, S, dim), out.shape
    err = float(jnp.max(jnp.abs(out - ref)))
    # bf16 MXU operands + tanh-GELU approximation vs exact-erf f32 reference.
    assert err < 5e-2, f"max abs err {err}"

    print("KERNEL_OK")
</pallas_src>

<mosaic_0001>
module attributes {stable_mosaic.version = 11 : i64} {
  func.func @_mlp_kernel(%arg0: i32, %arg1: i32, %arg2: memref<8x128xf32, #tpu.memory_space<vmem>>, %arg3: memref<128x128xbf16, #tpu.memory_space<vmem>>, %arg4: memref<128x128xbf16, #tpu.memory_space<vmem>>, %arg5: memref<1x128xf32, #tpu.memory_space<vmem>>, %arg6: memref<1x128xf32, #tpu.memory_space<vmem>>, %arg7: memref<8x128xf32, #tpu.memory_space<vmem>>, %arg8: memref<8x128xf32, #tpu.memory_space<vmem>>) attributes {dimension_semantics = [#tpu.dimension_semantics<parallel>, #tpu.dimension_semantics<arbitrary>], iteration_bounds = array<i64: 2, 1>, scalar_prefetch = 0 : i64, scratch_operands = 1 : i64, tpu.core_type = #tpu.core_type<tc>, window_params = [{transform_indices = @transform_0, window_bounds = array<i64: 8, 128>}, {pipeline_mode = #tpu.pipeline_mode<synchronous>, transform_indices = @transform_1, window_bounds = array<i64: 128, 128>}, {pipeline_mode = #tpu.pipeline_mode<synchronous>, transform_indices = @transform_2, window_bounds = array<i64: 128, 128>}, {pipeline_mode = #tpu.pipeline_mode<synchronous>, transform_indices = @transform_3, window_bounds = array<i64: 1, 128>}, {pipeline_mode = #tpu.pipeline_mode<synchronous>, transform_indices = @transform_4, window_bounds = array<i64: 1, 128>}, {transform_indices = @transform_5, window_bounds = array<i64: 8, 128>}]} {
    %c0_i32 = arith.constant 0 : i32
    %0 = arith.cmpi eq, %arg1, %c0_i32 : i32
    %1 = arith.extui %0 : i1 to i32
    %c0_i32_0 = arith.constant 0 : i32
    %2 = arith.cmpi ne, %1, %c0_i32_0 : i32
    scf.if %2 {
      %cst_19 = arith.constant 0.000000e+00 : f32
      %32 = vector.broadcast %cst_19 : f32 to vector<8x128xf32>
      %c0_20 = arith.constant 0 : index
      %c0_21 = arith.constant 0 : index
      %33 = vector.load %arg8[%c0_20, %c0_21] : memref<8x128xf32, #tpu.memory_space<vmem>>, vector<8x128xf32>
      tpu.vector_store %arg8[%c0_20, %c0_21], %32 {strides = array<i32>} : memref<8x128xf32, #tpu.memory_space<vmem>>, vector<8x128xf32>,
    } else {
    }
    %c0 = arith.constant 0 : index
    %c0_1 = arith.constant 0 : index
    %3 = vector.load %arg2[%c0, %c0_1] : memref<8x128xf32, #tpu.memory_space<vmem>>, vector<8x128xf32>
    %4 = arith.truncf %3 : vector<8x128xf32> to vector<8x128xbf16>
    %c0_2 = arith.constant 0 : index
    %c0_3 = arith.constant 0 : index
    %5 = vector.load %arg3[%c0_2, %c0_3] : memref<128x128xbf16, #tpu.memory_space<vmem>>, vector<128x128xbf16>
    %cst = arith.constant dense<0.000000e+00> : vector<8x128xf32>
    %6 = tpu.matmul %4, %5, %cst {dimension_numbers = #tpu.dot_dimension_numbers<[1], [0], [0], [1], [0, 0, 1, 1], [], []>} : vector<8x128xbf16>, vector<128x128xbf16>, vector<8x128xf32> -> vector<8x128xf32>
    %c0_4 = arith.constant 0 : index
    %c0_5 = arith.constant 0 : index
    %7 = vector.load %arg5[%c0_4, %c0_5] : memref<1x128xf32, #tpu.memory_space<vmem>>, vector<1x128xf32>
    %8 = vector.broadcast %7 : vector<1x128xf32> to vector<8x128xf32>
    %9 = arith.addf %6, %8 : vector<8x128xf32>
    %cst_6 = arith.constant 5.000000e-01 : f32
    %10 = vector.broadcast %cst_6 : f32 to vector<8x128xf32>
    %11 = arith.mulf %10, %9 : vector<8x128xf32>
    %cst_7 = arith.constant 4.471500e-02 : f32
    %12 = vector.broadcast %cst_7 : f32 to vector<8x128xf32>
    %13 = arith.mulf %12, %9 : vector<8x128xf32>
    %14 = arith.mulf %13, %9 : vector<8x128xf32>
    %15 = arith.mulf %14, %9 : vector<8x128xf32>
    %16 = arith.addf %9, %15 : vector<8x128xf32>
    %cst_8 = arith.constant 0.797884583 : f32
    %17 = vector.broadcast %cst_8 : f32 to vector<8x128xf32>
    %18 = arith.mulf %17, %16 : vector<8x128xf32>
    %19 = math.tanh %18 : vector<8x128xf32>
    %cst_9 = arith.constant 1.000000e+00 : f32
    %20 = vector.broadcast %cst_9 : f32 to vector<8x128xf32>
    %21 = arith.addf %20, %19 : vector<8x128xf32>
    %22 = arith.mulf %11, %21 : vector<8x128xf32>
    %c0_10 = arith.constant 0 : index
    %c0_11 = arith.constant 0 : index
    %23 = vector.load %arg8[%c0_10, %c0_11] : memref<8x128xf32, #tpu.memory_space<vmem>>, vector<8x128xf32>
    %24 = arith.truncf %22 : vector<8x128xf32> to vector<8x128xbf16>
    %c0_12 = arith.constant 0 : index
    %c0_13 = arith.constant 0 : index
    %25 = vector.load %arg4[%c0_12, %c0_13] : memref<128x128xbf16, #tpu.memory_space<vmem>>, vector<128x128xbf16>
    %cst_14 = arith.constant dense<0.000000e+00> : vector<8x128xf32>
    %26 = tpu.matmul %24, %25, %cst_14 {dimension_numbers = #tpu.dot_dimension_numbers<[1], [0], [0], [1], [0, 0, 1, 1], [], []>} : vector<8x128xbf16>, vector<128x128xbf16>, vector<8x128xf32> -> vector<8x128xf32>
    %27 = arith.addf %23, %26 : vector<8x128xf32>
    %c0_15 = arith.constant 0 : index
    %c0_16 = arith.constant 0 : index
    %28 = vector.load %arg8[%c0_15, %c0_16] : memref<8x128xf32, #tpu.memory_space<vmem>>, vector<8x128xf32>
    tpu.vector_store %arg8[%c0_15, %c0_16], %27 {strides = array<i32>} : memref<8x128xf32, #tpu.memory_space<vmem>>, vector<8x128xf32>,
    %c0_i32_17 = arith.constant 0 : i32
    %29 = arith.cmpi eq, %arg1, %c0_i32_17 : i32
    %30 = arith.extui %29 : i1 to i32
    %c0_i32_18 = arith.constant 0 : i32
    %31 = arith.cmpi ne, %30, %c0_i32_18 : i32
    scf.if %31 {
      %c0_19 = arith.constant 0 : index
      %c0_20 = arith.constant 0 : index
      %32 = vector.load %arg8[%c0_19, %c0_20] : memref<8x128xf32, #tpu.memory_space<vmem>>, vector<8x128xf32>
      %c0_21 = arith.constant 0 : index
      %c0_22 = arith.constant 0 : index
      %33 = vector.load %arg6[%c0_21, %c0_22] : memref<1x128xf32, #tpu.memory_space<vmem>>, vector<1x128xf32>
      %34 = vector.broadcast %33 : vector<1x128xf32> to vector<8x128xf32>
      %35 = arith.addf %32, %34 : vector<8x128xf32>
      %c0_23 = arith.constant 0 : index
      %c0_24 = arith.constant 0 : index
      %36 = vector.load %arg7[%c0_23, %c0_24] : memref<8x128xf32, #tpu.memory_space<vmem>>, vector<8x128xf32>
      tpu.vector_store %arg7[%c0_23, %c0_24], %35 {strides = array<i32>} : memref<8x128xf32, #tpu.memory_space<vmem>>, vector<8x128xf32>,
    } else {
    }
    return
  }
  func.func @transform_0(%arg0: i32, %arg1: i32) -> (i32, i32) {
    %c0_i32 = arith.constant 0 : i32
    %c0_i32_0 = arith.constant 0 : i32
    return %arg0, %c0_i32 : i32, i32
  }
  func.func @transform_1(%arg0: i32, %arg1: i32) -> (i32, i32) {
    %c0_i32 = arith.constant 0 : i32
    %c0_i32_0 = arith.constant 0 : i32
    %c0_i32_1 = arith.constant 0 : i32
    return %c0_i32, %c0_i32_0 : i32, i32
  }
  func.func @transform_2(%arg0: i32, %arg1: i32) -> (i32, i32) {
    %c0_i32 = arith.constant 0 : i32
    %c0_i32_0 = arith.constant 0 : i32
    %c0_i32_1 = arith.constant 0 : i32
    return %c0_i32, %c0_i32_0 : i32, i32
  }
  func.func @transform_3(%arg0: i32, %arg1: i32) -> (i32, i32) {
    %c0_i32 = arith.constant 0 : i32
    %c0_i32_0 = arith.constant 0 : i32
    %c0_i32_1 = arith.constant 0 : i32
    return %c0_i32, %c0_i32_0 : i32, i32
  }
  func.func @transform_4(%arg0: i32, %arg1: i32) -> (i32, i32) {
    %c0_i32 = arith.constant 0 : i32
    %c0_i32_0 = arith.constant 0 : i32
    %c0_i32_1 = arith.constant 0 : i32
    return %c0_i32, %c0_i32_0 : i32, i32
  }
  func.func @transform_5(%arg0: i32, %arg1: i32) -> (i32, i32) {
    %c0_i32 = arith.constant 0 : i32
    %c0_i32_0 = arith.constant 0 : i32
    return %arg0, %c0_i32 : i32, i32
  }
}

module attributes {stable_mosaic.version = 11 : i64} {
  func.func @_mlp_kernel(%arg0: i32, %arg1: i32, %arg2: memref<8x128xf32, #tpu.memory_space<vmem>>, %arg3: memref<128x128xbf16, #tpu.memory_space<vmem>>, %arg4: memref<128x128xbf16, #tpu.memory_space<vmem>>, %arg5: memref<1x128xf32, #tpu.memory_space<vmem>>, %arg6: memref<1x128xf32, #tpu.memory_space<vmem>>, %arg7: memref<8x128xf32, #tpu.memory_space<vmem>>, %arg8: memref<8x128xf32, #tpu.memory_space<vmem>>) attributes {dimension_semantics = [#tpu.dimension_semantics<parallel>, #tpu.dimension_semantics<arbitrary>], iteration_bounds = array<i64: 2, 1>, scalar_prefetch = 0 : i64, scratch_operands = 1 : i64, tpu.core_type = #tpu.core_type<tc>, window_params = [{transform_indices = @transform_0, window_bounds = array<i64: 8, 128>}, {pipeline_mode = #tpu.pipeline_mode<synchronous>, transform_indices = @transform_1, window_bounds = array<i64: 128, 128>}, {pipeline_mode = #tpu.pipeline_mode<synchronous>, transform_indices = @transform_2, window_bounds = array<i64: 128, 128>}, {pipeline_mode = #tpu.pipeline_mode<synchronous>, transform_indices = @transform_3, window_bounds = array<i64: 1, 128>}, {pipeline_mode = #tpu.pipeline_mode<synchronous>, transform_indices = @transform_4, window_bounds = array<i64: 1, 128>}, {transform_indices = @transform_5, window_bounds = array<i64: 8, 128>}]} {
    %c0_i32 = arith.constant 0 : i32
    %0 = arith.cmpi eq, %arg1, %c0_i32 : i32
    %1 = arith.extui %0 : i1 to i32
    %c0_i32_0 = arith.constant 0 : i32
    %2 = arith.cmpi ne, %1, %c0_i32_0 : i32
    scf.if %2 {
      %cst_19 = arith.constant 0.000000e+00 : f32
      %32 = vector.broadcast %cst_19 : f32 to vector<8x128xf32>
      %c0_20 = arith.constant 0 : index
      %c0_21 = arith.constant 0 : index
      %33 = vector.load %arg8[%c0_20, %c0_21] : memref<8x128xf32, #tpu.memory_space<vmem>>, vector<8x128xf32>
      tpu.vector_store %arg8[%c0_20, %c0_21], %32 {strides = array<i32>} : memref<8x128xf32, #tpu.memory_space<vmem>>, vector<8x128xf32>,
    } else {
    }
    %c0 = arith.constant 0 : index
    %c0_1 = arith.constant 0 : index
    %3 = vector.load %arg2[%c0, %c0_1] : memref<8x128xf32, #tpu.memory_space<vmem>>, vector<8x128xf32>
    %4 = arith.truncf %3 : vector<8x128xf32> to vector<8x128xbf16>
    %c0_2 = arith.constant 0 : index
    %c0_3 = arith.constant 0 : index
    %5 = vector.load %arg3[%c0_2, %c0_3] : memref<128x128xbf16, #tpu.memory_space<vmem>>, vector<128x128xbf16>
    %cst = arith.constant dense<0.000000e+00> : vector<8x128xf32>
    %6 = tpu.matmul %4, %5, %cst {dimension_numbers = #tpu.dot_dimension_numbers<[1], [0], [0], [1], [0, 0, 1, 1], [], []>} : vector<8x128xbf16>, vector<128x128xbf16>, vector<8x128xf32> -> vector<8x128xf32>
    %c0_4 = arith.constant 0 : index
    %c0_5 = arith.constant 0 : index
    %7 = vector.load %arg5[%c0_4, %c0_5] : memref<1x128xf32, #tpu.memory_space<vmem>>, vector<1x128xf32>
    %8 = vector.broadcast %7 : vector<1x128xf32> to vector<8x128xf32>
    %9 = arith.addf %6, %8 : vector<8x128xf32>
    %cst_6 = arith.constant 5.000000e-01 : f32
    %10 = vector.broadcast %cst_6 : f32 to vector<8x128xf32>
    %11 = arith.mulf %10, %9 : vector<8x128xf32>
    %cst_7 = arith.constant 4.471500e-02 : f32
    %12 = vector.broadcast %cst_7 : f32 to vector<8x128xf32>
    %13 = arith.mulf %12, %9 : vector<8x128xf32>
    %14 = arith.mulf %13, %9 : vector<8x128xf32>
    %15 = arith.mulf %14, %9 : vector<8x128xf32>
    %16 = arith.addf %9, %15 : vector<8x128xf32>
    %cst_8 = arith.constant 0.797884583 : f32
    %17 = vector.broadcast %cst_8 : f32 to vector<8x128xf32>
    %18 = arith.mulf %17, %16 : vector<8x128xf32>
    %19 = math.tanh %18 : vector<8x128xf32>
    %cst_9 = arith.constant 1.000000e+00 : f32
    %20 = vector.broadcast %cst_9 : f32 to vector<8x128xf32>
    %21 = arith.addf %20, %19 : vector<8x128xf32>
    %22 = arith.mulf %11, %21 : vector<8x128xf32>
    %c0_10 = arith.constant 0 : index
    %c0_11 = arith.constant 0 : index
    %23 = vector.load %arg8[%c0_10, %c0_11] : memref<8x128xf32, #tpu.memory_space<vmem>>, vector<8x128xf32>
    %24 = arith.truncf %22 : vector<8x128xf32> to vector<8x128xbf16>
    %c0_12 = arith.constant 0 : index
    %c0_13 = arith.constant 0 : index
    %25 = vector.load %arg4[%c0_12, %c0_13] : memref<128x128xbf16, #tpu.memory_space<vmem>>, vector<128x128xbf16>
    %cst_14 = arith.constant dense<0.000000e+00> : vector<8x128xf32>
    %26 = tpu.matmul %24, %25, %cst_14 {dimension_numbers = #tpu.dot_dimension_numbers<[1], [0], [0], [1], [0, 0, 1, 1], [], []>} : vector<8x128xbf16>, vector<128x128xbf16>, vector<8x128xf32> -> vector<8x128xf32>
    %27 = arith.addf %23, %26 : vector<8x128xf32>
    %c0_15 = arith.constant 0 : index
    %c0_16 = arith.constant 0 : index
    %28 = vector.load %arg8[%c0_15, %c0_16] : memref<8x128xf32, #tpu.memory_space<vmem>>, vector<8x128xf32>
    tpu.vector_store %arg8[%c0_15, %c0_16], %27 {strides = array<i32>} : memref<8x128xf32, #tpu.memory_space<vmem>>, vector<8x128xf32>,
    %c0_i32_17 = arith.constant 0 : i32
    %29 = arith.cmpi eq, %arg1, %c0_i32_17 : i32
    %30 = arith.extui %29 : i1 to i32
    %c0_i32_18 = arith.constant 0 : i32
    %31 = arith.cmpi ne, %30, %c0_i32_18 : i32
    scf.if %31 {
      %c0_19 = arith.constant 0 : index
      %c0_20 = arith.constant 0 : index
      %32 = vector.load %arg8[%c0_19, %c0_20] : memref<8x128xf32, #tpu.memory_space<vmem>>, vector<8x128xf32>
      %c0_21 = arith.constant 0 : index
      %c0_22 = arith.constant 0 : index
      %33 = vector.load %arg6[%c0_21, %c0_22] : memref<1x128xf32, #tpu.memory_space<vmem>>, vector<1x128xf32>
      %34 = vector.broadcast %33 : vector<1x128xf32> to vector<8x128xf32>
      %35 = arith.addf %32, %34 : vector<8x128xf32>
      %c0_23 = arith.constant 0 : index
      %c0_24 = arith.constant 0 : index
      %36 = vector.load %arg7[%c0_23, %c0_24] : memref<8x128xf32, #tpu.memory_space<vmem>>, vector<8x128xf32>
      tpu.vector_store %arg7[%c0_23, %c0_24], %35 {strides = array<i32>} : memref<8x128xf32, #tpu.memory_space<vmem>>, vector<8x128xf32>,
    } else {
    }
    return
  }
  func.func @transform_0(%arg0: i32, %arg1: i32) -> (i32, i32) {
    %c0_i32 = arith.constant 0 : i32
    %c0_i32_0 = arith.constant 0 : i32
    return %arg0, %c0_i32 : i32, i32
  }
  func.func @transform_1(%arg0: i32, %arg1: i32) -> (i32, i32) {
    %c0_i32 = arith.constant 0 : i32
    %c0_i32_0 = arith.constant 0 : i32
    %c0_i32_1 = arith.constant 0 : i32
    return %c0_i32, %c0_i32_0 : i32, i32
  }
  func.func @transform_2(%arg0: i32, %arg1: i32) -> (i32, i32) {
    %c0_i32 = arith.constant 0 : i32
    %c0_i32_0 = arith.constant 0 : i32
    %c0_i32_1 = arith.constant 0 : i32
    return %c0_i32, %c0_i32_0 : i32, i32
  }
  func.func @transform_3(%arg0: i32, %arg1: i32) -> (i32, i32) {
    %c0_i32 = arith.constant 0 : i32
    %c0_i32_0 = arith.constant 0 : i32
    %c0_i32_1 = arith.constant 0 : i32
    return %c0_i32, %c0_i32_0 : i32, i32
  }
  func.func @transform_4(%arg0: i32, %arg1: i32) -> (i32, i32) {
    %c0_i32 = arith.constant 0 : i32
    %c0_i32_0 = arith.constant 0 : i32
    %c0_i32_1 = arith.constant 0 : i32
    return %c0_i32, %c0_i32_0 : i32, i32
  }
  func.func @transform_5(%arg0: i32, %arg1: i32) -> (i32, i32) {
    %c0_i32 = arith.constant 0 : i32
    %c0_i32_0 = arith.constant 0 : i32
    return %arg0, %c0_i32 : i32, i32
  }
}

</mosaic_0001>

<bundles_post_ra>
// kernel: _mlp_forward_impl.1
= control target key start
LH: loop header
LB: loop body
LE: loop exit
PB: predicated region body
PF: predicated region fallthrough
CT: control target
= control target key end

     0   :  { %10 = vsyncpa [#allocation4], 0  ;;  %s887_s0 = inlined_call_operand.vmem [shape: f32[16,128], index: 0, kind: input, shape index: {}]   ;;  %s888_s1 = inlined_call_operand.hbm [shape: bf16[128,128], index: 1, kind: input, shape index: {}]   ;;  %s889_s2 = inlined_call_operand.hbm [shape: bf16[128,128], index: 2, kind: input, shape index: {}]   ;;  %s890_s3 = inlined_call_operand.vmem [shape: f32[1,128], index: 3, kind: input, shape index: {}]   ;;  %s891_s4 = inlined_call_operand.vmem [shape: f32[1,128], index: 4, kind: input, shape index: {}]   ;;  %s892_s5 = inlined_call_operand.vmem [shape: f32[16,128], index: 5, kind: output, shape index: {}]  }
   0x1   :  { %11 = vsyncpa [#allocation6], 0  ;;  %s808_s18 = smov 0   ;;  %s810_s19 = smov 0  }
   0x2   :  { %s812_s20 = smov 0  }
   0x3 LB: > { %s538_s21 = sadd.s32 4294967295, %s772_s20   ;;  %s29_s22 = sadd.s32 1, %s768_s19  ;;  %s772_s20 = sphi %s812_s20, %s17_s20   ;;  %s768_s19 = sphi %s810_s19, %s896_s19   ;;  %s764_s18 = sphi %s808_s18, %s895_s18  }
   0x4   : > { %p31_p0 = scmp.ge.s32.totalorder %s29_s22, 2  ;;  %p540_p1 = scmp.ge.s32.totalorder %s772_s20, 1 }
   0x5   : > { %p170_p2 = scmp.lt.s32.totalorder %s772_s20, 3  ;;  %p833_p4 = scmp.eq.s32.totalorder %s538_s21, 0 }
   0x6   : > { %s898_s22 = smov (%p31_p0, %s29_s22), 0  ;;  %s181_s27 = sshll.u32 %s888_s1, 4  ;;  %s182_s27 = int_to_ptr.hbm [resolvable:$true] %s181_s27 }
   0x7   : > { %p829_p3 = pnand %p540_p1, %p170_p2  ;;  %s774_s28 = smov [#allocation3]  }
   0x8   : > { %s183_s29 = sshll.u32 %s774_s28, 4  ;;  %s195_s7 = sshll.u32 %s889_s2, 4  ;;  %s184_s29 = int_to_ptr.vmem [resolvable:$true] %s183_s29  ;;  %s196_s7 = int_to_ptr.hbm [resolvable:$true] %s195_s7 }
   0x9   : > { %p639_p5 = pneg %p829_p3  ;;  %s775_s8 = smov 64  }
   0xa   : > { %s776_s9 = smov 4   ;;  %s777_s10 = smov [#allocation5]  }
   0xb   : > { %p640_p6 = pnand %p833_p4, %p639_p5  ;;  %s197_s11 = sshll.u32 %s777_s10, 4  ;;  %s198_s11 = int_to_ptr.vmem [resolvable:$true] %s197_s11 }
   0xc   : > { %226 = sbr.rel (%p829_p3) target bundleno = 337 (0x151), region = 40 }
   0xd   : > { %642 = dma.hbm_to_vmem [thread:$0]  (!%p640_p6), %s182_s27, 1024, %s184_s29, [#allocation4], %s775_s8, %s775_s8, %s776_s9  }
   0xe   : > { %645 = dma.hbm_to_vmem [thread:$0]  (!%p640_p6), %s196_s7, 1024, %s198_s11, [#allocation6], %s775_s8, %s775_s8, %s776_s9  }
  0x11   : > { %755 = dma.done.wait (%p833_p4), [#allocation4], 1024  }
  0x12   : > { %757 = vsyncadd (%p833_p4), [#allocation4], 4294966272 }
  0x13   : > { %759 = dma.done.wait (%p833_p4), [#allocation6], 1024  }
  0x14   : > { %761 = vsyncadd (%p833_p4), [#allocation6], 4294966272  ;;  %v622_v0 = vld [vmem:[#allocation3 + $0x38] sm:$0xff]  ;;  %v621_v1 = vld [vmem:[#allocation3 + $0x30] sm:$0xff]  ;;  %p258_p7 = scmp.lt.s32.totalorder %s764_s18, 1 }
  0x15   : > { %341 = vmatpush.bf16.msra.mxu0 %v622_v0  ;;  %v630_v2 = vld [vmem:[#allocation5 + $0x38] sm:$0xff]  ;;  %v629_v3 = vld [vmem:[#allocation5 + $0x30] sm:$0xff]  ;;  %v620_v4 = vld [vmem:[#allocation3 + $0x28] sm:$0xff] }
  0x16   : > { %429 = vmatpush.bf16.msra.mxu1 %v630_v2  ;;  %v619_v5 = vld [vmem:[#allocation3 + $0x20] sm:$0xff]  ;;  %v618_v6 = vld [vmem:[#allocation3 + $0x18] sm:$0xff]  ;;  %s900_s18 = smov (!%p258_p7, %s764_s18), 1  ;;  %v617_v7 = vld [vmem:[#allocation3 + $0x10] sm:$0xff] }
  0x17   : > { %s547_s12 = sshll.u32 %s900_s18, 3  ;;  %v616_v8 = vld [vmem:[#allocation3 + $0x8] sm:$0xff]  ;;  %v615_v9 = vld [vmem:[#allocation3] sm:$0xff]  ;;  %v626_v14 = vld [vmem:[#allocation5 + $0x18] sm:$0xff] }
  0x18   : > { %s261_s15 = scalar_lea.vmem %s887_s0, %s547_s12  ;;  %v628_v12 = vld [vmem:[#allocation5 + $0x28] sm:$0xff]  ;;  %v627_v13 = vld [vmem:[#allocation5 + $0x20] sm:$0xff]  ;;  %v625_v15 = vld [vmem:[#allocation5 + $0x10] sm:$0xff]  ;;  %s265_s26 = scalar_lea.vmem %s892_s5, %s547_s12 }
  0x19   : > { %342 = vmatpush.bf16.msra.mxu0 %v621_v1  ;;  %v271_v10 = vld [vmem:[%s261_s15] sm:$0xff]  ;;  %v624_v16 = vld [vmem:[#allocation5 + $0x8] sm:$0xff] }
  0x1a   : > { %430 = vmatpush.bf16.msra.mxu1 %v629_v3  ;;  %v272_v11 = vpack.c.bf16 %v271_v10, %v271_v10  ;;  %v623_v17 = vld [vmem:[#allocation5] sm:$0xff] }
  0x1b   : > { %v678_v18 = vld [vmem:[%s890_s3] ss:$0 sm:$0xff] }
  0x1c   : > { %v679_v32 = vld [vmem:[%s891_s4] ss:$0 sm:$0xff] }
  0x1d   : > { %343 = vmatpush.bf16.msra.mxu0 %v620_v4 }
  0x1e   : > { %431 = vmatpush.bf16.msra.mxu1 %v628_v12 }
  0x21   : > { %344 = vmatpush.bf16.msra.mxu0 %v619_v5 }
  0x22   : > { %432 = vmatpush.bf16.msra.mxu1 %v627_v13 }
  0x25   : > { %345 = vmatpush.bf16.msra.mxu0 %v618_v6 }
  0x26   : > { %433 = vmatpush.bf16.msra.mxu1 %v626_v14 }
  0x29   : > { %346 = vmatpush.bf16.msra.mxu0 %v617_v7 }
  0x2a   : > { %434 = vmatpush.bf16.msra.mxu1 %v625_v15 }
  0x2d   : > { %347 = vmatpush.bf16.msra.mxu0 %v616_v8 }
  0x2e   : > { %435 = vmatpush.bf16.msra.mxu1 %v624_v16 }
  0x31   : > { %348 = vmatpush.bf16.msra.mxu0 %v615_v9 }
  0x32   : > { %436 = vmatpush.bf16.msra.mxu1 %v623_v17 }
  0x34   : > { %349 = vmatmul.bf16.vlgmr.msra.gmra.mxu0 %v272_v11 }
  0xb1   : > { %v350_v19 = vpop.f32.mrf.mxu0 }
  0xb2   : > { %v351_v20 = vadd.f32 %v678_v18, %v350_v19 }
  0xb4   : > { %v355_v21 = vmul.f32 0.044715, %v351_v20  ;;  %v354_v28 = vmul.f32 0.5, %v351_v20 }
  0xb6   : > { %v356_v22 = vmul.f32 %v355_v21, %v351_v20 }
  0xb8   : > { %v357_v23 = vmul.f32 %v356_v22, %v351_v20 }
  0xb9   : > { %v352_v24 = vpop.f32.mrf.mxu0 }
  0xba   : > { %v358_v25 = vadd.f32 %v357_v23, %v351_v20 }
  0xbc   : > { %v359_v26 = vmul.f32 0.7978846, %v358_v25 }
  0xbe   : > { %680 = vtanh.f32 %v359_v26 }
  0xc4   : > { %v681_v27 = vpop.eup %680 }
  0xc5   : > { %v361_v29 = vadd.f32 1.0, %v681_v27 }
  0xc7   : > { %v362_v30 = vmul.f32 %v361_v29, %v354_v28 }
  0xc9   : > { %v364_v31 = vpack.c.bf16 %v362_v30, %v362_v30 }
  0xcb   : > { %437 = vmatmul.bf16.vlgmr.msra.gmra.mxu1 %v364_v31 }
 0x148   : > { %v438_v33 = vpop.f32.mrf.mxu1 }
 0x149   : > { %v452_v34 = vadd.f32 %v679_v32, %v438_v33 }
 0x14b   : > { %453 = vst [vmem:[%s265_s26] sm:$0xff] %v452_v34 }
 0x150   : > { %v440_v35 = vpop.f32.mrf.mxu1 }
 0x151 PF: > { %s17_s20 = sadd.s32 1, %s772_s20   ;;  %s895_s18 = smov %s768_s19 }
 0x152   : > { %p14_p8 = scmp.ge.s32.totalorder %s17_s20, 4   ;;  %s896_s19 = smov %s898_s22 }
 0x154   :  { %16 = sbr.rel (!%p14_p8) target bundleno = 3 (0x3), region = 87 }
 0x159   :  { %473 = vsyncpa [#allocation4], 1 }
 0x15a   :  { %475 = vsyncpa [#allocation4 + $0x1], 1 }
 0x15b   :  { %476 = vsyncpa [#allocation6], 1 }

// kernel: _mlp_forward_impl.1
= control target key start
LH: loop header
LB: loop body
LE: loop exit
PB: predicated region body
PF: predicated region fallthrough
CT: control target
= control target key end

     0   :  { %10 = vsyncpa [#allocation4], 0  ;;  %s887_s0 = inlined_call_operand.vmem [shape: f32[16,128], index: 0, kind: input, shape index: {}]   ;;  %s888_s1 = inlined_call_operand.hbm [shape: bf16[128,128], index: 1, kind: input, shape index: {}]   ;;  %s889_s2 = inlined_call_operand.hbm [shape: bf16[128,128], index: 2, kind: input, shape index: {}]   ;;  %s890_s3 = inlined_call_operand.vmem [shape: f32[1,128], index: 3, kind: input, shape index: {}]   ;;  %s891_s4 = inlined_call_operand.vmem [shape: f32[1,128], index: 4, kind: input, shape index: {}]   ;;  %s892_s5 = inlined_call_operand.vmem [shape: f32[16,128], index: 5, kind: output, shape index: {}]  }
   0x1   :  { %11 = vsyncpa [#allocation6], 0  ;;  %s808_s18 = smov 0   ;;  %s810_s19 = smov 0  }
   0x2   :  { %s812_s20 = smov 0  }
   0x3 LB: > { %s538_s21 = sadd.s32 4294967295, %s772_s20   ;;  %s29_s22 = sadd.s32 1, %s768_s19  ;;  %s772_s20 = sphi %s812_s20, %s17_s20   ;;  %s768_s19 = sphi %s810_s19, %s896_s19   ;;  %s764_s18 = sphi %s808_s18, %s895_s18  }
   0x4   : > { %p31_p0 = scmp.ge.s32.totalorder %s29_s22, 2  ;;  %p540_p1 = scmp.ge.s32.totalorder %s772_s20, 1 }
   0x5   : > { %p170_p2 = scmp.lt.s32.totalorder %s772_s20, 3  ;;  %p833_p4 = scmp.eq.s32.totalorder %s538_s21, 0 }
   0x6   : > { %s898_s22 = smov (%p31_p0, %s29_s22), 0  ;;  %s181_s27 = sshll.u32 %s888_s1, 4  ;;  %s182_s27 = int_to_ptr.hbm [resolvable:$true] %s181_s27 }
   0x7   : > { %p829_p3 = pnand %p540_p1, %p170_p2  ;;  %s774_s28 = smov [#allocation3]  }
   0x8   : > { %s183_s29 = sshll.u32 %s774_s28, 4  ;;  %s195_s7 = sshll.u32 %s889_s2, 4  ;;  %s184_s29 = int_to_ptr.vmem [resolvable:$true] %s183_s29  ;;  %s196_s7 = int_to_ptr.hbm [resolvable:$true] %s195_s7 }
   0x9   : > { %p639_p5 = pneg %p829_p3  ;;  %s775_s8 = smov 64  }
   0xa   : > { %s776_s9 = smov 4   ;;  %s777_s10 = smov [#allocation5]  }
   0xb   : > { %p640_p6 = pnand %p833_p4, %p639_p5  ;;  %s197_s11 = sshll.u32 %s777_s10, 4  ;;  %s198_s11 = int_to_ptr.vmem [resolvable:$true] %s197_s11 }
   0xc   : > { %226 = sbr.rel (%p829_p3) target bundleno = 337 (0x151), region = 40 }
   0xd   : > { %642 = dma.hbm_to_vmem [thread:$0]  (!%p640_p6), %s182_s27, 1024, %s184_s29, [#allocation4], %s775_s8, %s775_s8, %s776_s9  }
   0xe   : > { %645 = dma.hbm_to_vmem [thread:$0]  (!%p640_p6), %s196_s7, 1024, %s198_s11, [#allocation6], %s775_s8, %s775_s8, %s776_s9  }
  0x11   : > { %755 = dma.done.wait (%p833_p4), [#allocation4], 1024  }
  0x12   : > { %757 = vsyncadd (%p833_p4), [#allocation4], 4294966272 }
  0x13   : > { %759 = dma.done.wait (%p833_p4), [#allocation6], 1024  }
  0x14   : > { %761 = vsyncadd (%p833_p4), [#allocation6], 4294966272  ;;  %v622_v0 = vld [vmem:[#allocation3 + $0x38] sm:$0xff]  ;;  %v621_v1 = vld [vmem:[#allocation3 + $0x30] sm:$0xff]  ;;  %p258_p7 = scmp.lt.s32.totalorder %s764_s18, 1 }
  0x15   : > { %341 = vmatpush.bf16.msra.mxu0 %v622_v0  ;;  %v630_v2 = vld [vmem:[#allocation5 + $0x38] sm:$0xff]  ;;  %v629_v3 = vld [vmem:[#allocation5 + $0x30] sm:$0xff]  ;;  %v620_v4 = vld [vmem:[#allocation3 + $0x28] sm:$0xff] }
  0x16   : > { %429 = vmatpush.bf16.msra.mxu1 %v630_v2  ;;  %v619_v5 = vld [vmem:[#allocation3 + $0x20] sm:$0xff]  ;;  %v618_v6 = vld [vmem:[#allocation3 + $0x18] sm:$0xff]  ;;  %s900_s18 = smov (!%p258_p7, %s764_s18), 1  ;;  %v617_v7 = vld [vmem:[#allocation3 + $0x10] sm:$0xff] }
  0x17   : > { %s547_s12 = sshll.u32 %s900_s18, 3  ;;  %v616_v8 = vld [vmem:[#allocation3 + $0x8] sm:$0xff]  ;;  %v615_v9 = vld [vmem:[#allocation3] sm:$0xff]  ;;  %v626_v14 = vld [vmem:[#allocation5 + $0x18] sm:$0xff] }
  0x18   : > { %s261_s15 = scalar_lea.vmem %s887_s0, %s547_s12  ;;  %v628_v12 = vld [vmem:[#allocation5 + $0x28] sm:$0xff]  ;;  %v627_v13 = vld [vmem:[#allocation5 + $0x20] sm:$0xff]  ;;  %v625_v15 = vld [vmem:[#allocation5 + $0x10] sm:$0xff]  ;;  %s265_s26 = scalar_lea.vmem %s892_s5, %s547_s12 }
  0x19   : > { %342 = vmatpush.bf16.msra.mxu0 %v621_v1  ;;  %v271_v10 = vld [vmem:[%s261_s15] sm:$0xff]  ;;  %v624_v16 = vld [vmem:[#allocation5 + $0x8] sm:$0xff] }
  0x1a   : > { %430 = vmatpush.bf16.msra.mxu1 %v629_v3  ;;  %v272_v11 = vpack.c.bf16 %v271_v10, %v271_v10  ;;  %v623_v17 = vld [vmem:[#allocation5] sm:$0xff] }
  0x1b   : > { %v678_v18 = vld [vmem:[%s890_s3] ss:$0 sm:$0xff] }
  0x1c   : > { %v679_v32 = vld [vmem:[%s891_s4] ss:$0 sm:$0xff] }
  0x1d   : > { %343 = vmatpush.bf16.msra.mxu0 %v620_v4 }
  0x1e   : > { %431 = vmatpush.bf16.msra.mxu1 %v628_v12 }
  0x21   : > { %344 = vmatpush.bf16.msra.mxu0 %v619_v5 }
  0x22   : > { %432 = vmatpush.bf16.msra.mxu1 %v627_v13 }
  0x25   : > { %345 = vmatpush.bf16.msra.mxu0 %v618_v6 }
  0x26   : > { %433 = vmatpush.bf16.msra.mxu1 %v626_v14 }
  0x29   : > { %346 = vmatpush.bf16.msra.mxu0 %v617_v7 }
  0x2a   : > { %434 = vmatpush.bf16.msra.mxu1 %v625_v15 }
  0x2d   : > { %347 = vmatpush.bf16.msra.mxu0 %v616_v8 }
  0x2e   : > { %435 = vmatpush.bf16.msra.mxu1 %v624_v16 }
  0x31   : > { %348 = vmatpush.bf16.msra.mxu0 %v615_v9 }
  0x32   : > { %436 = vmatpush.bf16.msra.mxu1 %v623_v17 }
  0x34   : > { %349 = vmatmul.bf16.vlgmr.msra.gmra.mxu0 %v272_v11 }
  0xb1   : > { %v350_v19 = vpop.f32.mrf.mxu0 }
  0xb2   : > { %v351_v20 = vadd.f32 %v678_v18, %v350_v19 }
  0xb4   : > { %v355_v21 = vmul.f32 0.044715, %v351_v20  ;;  %v354_v28 = vmul.f32 0.5, %v351_v20 }
  0xb6   : > { %v356_v22 = vmul.f32 %v355_v21, %v351_v20 }
  0xb8   : > { %v357_v23 = vmul.f32 %v356_v22, %v351_v20 }
  0xb9   : > { %v352_v24 = vpop.f32.mrf.mxu0 }
  0xba   : > { %v358_v25 = vadd.f32 %v357_v23, %v351_v20 }
  0xbc   : > { %v359_v26 = vmul.f32 0.7978846, %v358_v25 }
  0xbe   : > { %680 = vtanh.f32 %v359_v26 }
  0xc4   : > { %v681_v27 = vpop.eup %680 }
  0xc5   : > { %v361_v29 = vadd.f32 1.0, %v681_v27 }
  0xc7   : > { %v362_v30 = vmul.f32 %v361_v29, %v354_v28 }
  0xc9   : > { %v364_v31 = vpack.c.bf16 %v362_v30, %v362_v30 }
  0xcb   : > { %437 = vmatmul.bf16.vlgmr.msra.gmra.mxu1 %v364_v31 }
 0x148   : > { %v438_v33 = vpop.f32.mrf.mxu1 }
 0x149   : > { %v452_v34 = vadd.f32 %v679_v32, %v438_v33 }
 0x14b   : > { %453 = vst [vmem:[%s265_s26] sm:$0xff] %v452_v34 }
 0x150   : > { %v440_v35 = vpop.f32.mrf.mxu1 }
 0x151 PF: > { %s17_s20 = sadd.s32 1, %s772_s20   ;;  %s895_s18 = smov %s768_s19 }
 0x152   : > { %p14_p8 = scmp.ge.s32.totalorder %s17_s20, 4   ;;  %s896_s19 = smov %s898_s22 }
 0x154   :  { %16 = sbr.rel (!%p14_p8) target bundleno = 3 (0x3), region = 87 }
 0x159   :  { %473 = vsyncpa [#allocation4], 1 }
 0x15a   :  { %475 = vsyncpa [#allocation4 + $0x1], 1 }
 0x15b   :  { %476 = vsyncpa [#allocation6], 1 }

</bundles_post_ra>
